<compile_context>
chip_gen: v5e
topology: v5e:2x2
jax: 0.10.0
libtpu: 0.0.40
codegen_flags: <defaults>
</compile_context>

<pallas_src>
import functools

import jax
import jax.numpy as jnp
import numpy as np
from jax import lax
from jax.experimental import pallas as pl
from jax.experimental.pallas import tpu as pltpu


# ----------------------------------------------------------------------------
# Fused kernel: projections + attention + concat + out-proj + residual + LN.
# grid = (1,); all operands fit comfortably in VMEM at these sizes.
# ----------------------------------------------------------------------------
def _fused_mha_kernel(q_ref, k_ref, v_ref, wq_ref, wk_ref, wv_ref,
                      pw_ref, pb_ref, g_ref, beta_ref,
                      out_ref, attn_ref, *, qty_head, dim_k, dim_v,
                      temper, eps):
    q = q_ref[...]            # (q_len, dim_model)
    k = k_ref[...]            # (k_len, dim_model)
    v = v_ref[...]            # (v_len, dim_model)

    # All-head projections: one wide MXU push per projection.
    qh = jnp.dot(q, wq_ref[...], preferred_element_type=jnp.float32)  # (q, H*dk)
    kh = jnp.dot(k, wk_ref[...], preferred_element_type=jnp.float32)  # (k, H*dk)
    vh = jnp.dot(v, wv_ref[...], preferred_element_type=jnp.float32)  # (v, H*dv)

    inv_temper = 1.0 / temper
    outs = []
    for h in range(qty_head):                       # static, fully unrolled
        qh_h = qh[:, h * dim_k:(h + 1) * dim_k]     # (q_len, dim_k)
        kh_h = kh[:, h * dim_k:(h + 1) * dim_k]     # (k_len, dim_k)
        vh_h = vh[:, h * dim_v:(h + 1) * dim_v]     # (v_len, dim_v)

        # qh_h @ kh_h.T without an explicit transpose (contract dim_k dims).
        scores = lax.dot_general(
            qh_h, kh_h, (((1,), (1,)), ((), ())),
            preferred_element_type=jnp.float32) * inv_temper   # (q_len, k_len)

        # Softmax over the QUERY axis (axis 0), mirroring nn.Softmax(dim=1)
        # applied to the (H*B, q_len, k_len) tensor in the reference.
        m = jnp.max(scores, axis=0, keepdims=True)
        e = jnp.exp(scores - m)
        attn_h = e * pl.reciprocal(jnp.sum(e, axis=0, keepdims=True),
                                   approx=False)
        # TODO(synk): attention dropout omitted (eval-mode identity).

        attn_ref[h] = attn_h
        outs.append(jnp.dot(attn_h, vh_h, preferred_element_type=jnp.float32))

    # Head concat, lane-dense: (q_len, H*dim_v), head index major in last dim
    # (matches torch.cat(torch.split(out, batch, 0), dim=-1) for batch == 1).
    cat = jnp.concatenate(outs, axis=-1)

    # Output projection: cat @ W.T + b, contracting in_features of both
    # operands so no weight transpose is materialized in-kernel.
    y = lax.dot_general(cat, pw_ref[...], (((1,), (1,)), ((), ())),
                        preferred_element_type=jnp.float32) + pb_ref[...]
    # TODO(synk): output dropout omitted (eval-mode identity).
    y = y + q                                      # residual (original q)

    mean = jnp.mean(y, axis=-1, keepdims=True)
    var = jnp.mean((y - mean) ** 2, axis=-1, keepdims=True)
    norm = (y - mean) * lax.rsqrt(var + eps)
    out_ref[...] = norm * g_ref[...] + beta_ref[...]


# ----------------------------------------------------------------------------
# Wrapper
# ----------------------------------------------------------------------------
def multi_head_attention(q, k, v, params, *, qty_head, dim_model, dim_k, dim_v):
    """q, k, v: (1, seq_len, dim_model).  Returns (out, attn) like the module."""
    assert q.shape[0] == 1, "reference torch.bmm semantics require batch == 1"
    q2 = q[0].astype(jnp.float32)       # (q_len, dim_model)
    k2 = k[0].astype(jnp.float32)       # (k_len, dim_model)
    v2 = v[0].astype(jnp.float32)       # (v_len, dim_model)
    q_len, k_len, v_len = q2.shape[0], k2.shape[0], v2.shape[0]

    # Lane-dense weight slabs: column block h of the slab equals weight[h].
    wq = jnp.transpose(params["wq"], (1, 0, 2)).reshape(dim_model, qty_head * dim_k)
    wk = jnp.transpose(params["wk"], (1, 0, 2)).reshape(dim_model, qty_head * dim_k)
    wv = jnp.transpose(params["wv"], (1, 0, 2)).reshape(dim_model, qty_head * dim_v)
    proj_w, proj_b = params["proj_w"], params["proj_b"]   # torch Linear layout
    gamma, beta = params["ln_gamma"], params["ln_beta"]

    temper = float(np.power(dim_model, 0.5))

    out2d, attn = pl.pallas_call(
        functools.partial(_fused_mha_kernel, qty_head=qty_head, dim_k=dim_k,
                          dim_v=dim_v, temper=temper, eps=1e-5),
        grid=(1,),
        in_specs=[
            pl.BlockSpec((q_len, dim_model), lambda i: (0, 0)),
            pl.BlockSpec((k_len, dim_model), lambda i: (0, 0)),
            pl.BlockSpec((v_len, dim_model), lambda i: (0, 0)),
            pl.BlockSpec((dim_model, qty_head * dim_k), lambda i: (0, 0)),
            pl.BlockSpec((dim_model, qty_head * dim_k), lambda i: (0, 0)),
            pl.BlockSpec((dim_model, qty_head * dim_v), lambda i: (0, 0)),
            pl.BlockSpec((dim_model, qty_head * dim_v), lambda i: (0, 0)),
            pl.BlockSpec((1, dim_model), lambda i: (0, 0)),
            pl.BlockSpec((1, dim_model), lambda i: (0, 0)),
            pl.BlockSpec((1, dim_model), lambda i: (0, 0)),
        ],
        out_specs=[
            pl.BlockSpec((q_len, dim_model), lambda i: (0, 0)),
            pl.BlockSpec((qty_head, q_len, k_len), lambda i: (0, 0, 0)),
        ],
        out_shape=[
            jax.ShapeDtypeStruct((q_len, dim_model), jnp.float32),
            jax.ShapeDtypeStruct((qty_head, q_len, k_len), jnp.float32),
        ],
    )(q2, k2, v2, wq, wk, wv, proj_w, proj_b, gamma, beta)

    return out2d[None, :, :], attn


# ----------------------------------------------------------------------------
# Plain-JAX reference (mirrors the torch forward, eval mode, f32)
# ----------------------------------------------------------------------------
def _reference(q, k, v, params, *, qty_head, dim_model, dim_k, dim_v):
    q2, k2, v2 = q[0], k[0], v[0]
    qh = jnp.einsum("sd,hdk->hsk", q2, params["wq"])
    kh = jnp.einsum("sd,hdk->hsk", k2, params["wk"])
    vh = jnp.einsum("sd,hdk->hsk", v2, params["wv"])
    scores = jnp.einsum("hqk,hsk->hqs", qh, kh) / np.power(dim_model, 0.5)
    attn = jax.nn.softmax(scores, axis=1)          # dim=1 like the reference
    out = jnp.einsum("hqs,hsv->hqv", attn, vh)
    cat = jnp.transpose(out, (1, 0, 2)).reshape(q2.shape[0], qty_head * dim_v)
    y = cat @ params["proj_w"].T + params["proj_b"][0]
    y = y + q2
    mean = jnp.mean(y, axis=-1, keepdims=True)
    var = jnp.mean((y - mean) ** 2, axis=-1, keepdims=True)
    y = (y - mean) / jnp.sqrt(var + 1e-5) * params["ln_gamma"][0] + params["ln_beta"][0]
    return y[None], attn


if __name__ == "__main__":
    qty_head, dim_model, dim_k, dim_v = 4, 32, 16, 16
    batch, seq = 1, 8

    key = jax.random.PRNGKey(0)
    kq, kk, kv, kwq, kwk, kwv, kpw, kpb = jax.random.split(key, 8)

    # Xavier-normal-style deterministic init for the per-head weights.
    std_k = float(np.sqrt(2.0 / (dim_model * dim_k + qty_head * dim_k)))
    std_v = float(np.sqrt(2.0 / (dim_model * dim_v + qty_head * dim_v)))
    params = {
        "wq": std_k * jax.random.normal(kwq, (qty_head, dim_model, dim_k), jnp.float32),
        "wk": std_k * jax.random.normal(kwk, (qty_head, dim_model, dim_k), jnp.float32),
        "wv": std_v * jax.random.normal(kwv, (qty_head, dim_model, dim_v), jnp.float32),
        "proj_w": (1.0 / np.sqrt(qty_head * dim_v))
        * jax.random.normal(kpw, (dim_model, qty_head * dim_v), jnp.float32),
        "proj_b": (1.0 / np.sqrt(qty_head * dim_v))
        * jax.random.normal(kpb, (1, dim_model), jnp.float32),
        "ln_gamma": jnp.ones((1, dim_model), jnp.float32),
        "ln_beta": jnp.zeros((1, dim_model), jnp.float32),
    }

    q = jax.random.normal(kq, (batch, seq, dim_model), jnp.float32)
    k = jax.random.normal(kk, (batch, seq, dim_model), jnp.float32)
    v = jax.random.normal(kv, (batch, seq, dim_model), jnp.float32)

    out, attn = multi_head_attention(
        q, k, v, params,
        qty_head=qty_head, dim_model=dim_model, dim_k=dim_k, dim_v=dim_v)
    jax.block_until_ready((out, attn))

    ref_out, ref_attn = _reference(
        q, k, v, params,
        qty_head=qty_head, dim_model=dim_model, dim_k=dim_k, dim_v=dim_v)
    np.testing.assert_allclose(np.asarray(out), np.asarray(ref_out),
                               rtol=1e-4, atol=1e-4)
    np.testing.assert_allclose(np.asarray(attn), np.asarray(ref_attn),
                               rtol=1e-4, atol=1e-4)

    print("KERNEL_OK")
</pallas_src>

<mosaic_0001>
module attributes {stable_mosaic.version = 11 : i64} {
  func.func @_fused_mha_kernel(%arg0: i32, %arg1: memref<8x32xf32, #tpu.memory_space<vmem>>, %arg2: memref<8x32xf32, #tpu.memory_space<vmem>>, %arg3: memref<8x32xf32, #tpu.memory_space<vmem>>, %arg4: memref<32x64xf32, #tpu.memory_space<vmem>>, %arg5: memref<32x64xf32, #tpu.memory_space<vmem>>, %arg6: memref<32x64xf32, #tpu.memory_space<vmem>>, %arg7: memref<32x64xf32, #tpu.memory_space<vmem>>, %arg8: memref<1x32xf32, #tpu.memory_space<vmem>>, %arg9: memref<1x32xf32, #tpu.memory_space<vmem>>, %arg10: memref<1x32xf32, #tpu.memory_space<vmem>>, %arg11: memref<8x32xf32, #tpu.memory_space<vmem>>, %arg12: memref<4x8x8xf32, #tpu.memory_space<vmem>>) attributes {dimension_semantics = [#tpu.dimension_semantics<arbitrary>], iteration_bounds = array<i64: 1>, scalar_prefetch = 0 : i64, scratch_operands = 0 : i64, tpu.core_type = #tpu.core_type<tc>, window_params = [{pipeline_mode = #tpu.pipeline_mode<synchronous>, transform_indices = @transform_0, window_bounds = array<i64: 8, 32>}, {pipeline_mode = #tpu.pipeline_mode<synchronous>, transform_indices = @transform_1, window_bounds = array<i64: 8, 32>}, {pipeline_mode = #tpu.pipeline_mode<synchronous>, transform_indices = @transform_2, window_bounds = array<i64: 8, 32>}, {pipeline_mode = #tpu.pipeline_mode<synchronous>, transform_indices = @transform_3, window_bounds = array<i64: 32, 64>}, {pipeline_mode = #tpu.pipeline_mode<synchronous>, transform_indices = @transform_4, window_bounds = array<i64: 32, 64>}, {pipeline_mode = #tpu.pipeline_mode<synchronous>, transform_indices = @transform_5, window_bounds = array<i64: 32, 64>}, {pipeline_mode = #tpu.pipeline_mode<synchronous>, transform_indices = @transform_6, window_bounds = array<i64: 32, 64>}, {pipeline_mode = #tpu.pipeline_mode<synchronous>, transform_indices = @transform_7, window_bounds = array<i64: 1, 32>}, {pipeline_mode = #tpu.pipeline_mode<synchronous>, transform_indices = @transform_8, window_bounds = array<i64: 1, 32>}, {pipeline_mode = #tpu.pipeline_mode<synchronous>, transform_indices = @transform_9, window_bounds = array<i64: 1, 32>}, {pipeline_mode = #tpu.pipeline_mode<synchronous>, transform_indices = @transform_10, window_bounds = array<i64: 8, 32>}, {pipeline_mode = #tpu.pipeline_mode<synchronous>, transform_indices = @transform_11, window_bounds = array<i64: 4, 8, 8>}]} {
    %c0 = arith.constant 0 : index
    %c0_0 = arith.constant 0 : index
    %0 = vector.load %arg1[%c0, %c0_0] : memref<8x32xf32, #tpu.memory_space<vmem>>, vector<8x32xf32>
    %c0_1 = arith.constant 0 : index
    %c0_2 = arith.constant 0 : index
    %1 = vector.load %arg2[%c0_1, %c0_2] : memref<8x32xf32, #tpu.memory_space<vmem>>, vector<8x32xf32>
    %c0_3 = arith.constant 0 : index
    %c0_4 = arith.constant 0 : index
    %2 = vector.load %arg3[%c0_3, %c0_4] : memref<8x32xf32, #tpu.memory_space<vmem>>, vector<8x32xf32>
    %c0_5 = arith.constant 0 : index
    %c0_6 = arith.constant 0 : index
    %3 = vector.load %arg4[%c0_5, %c0_6] : memref<32x64xf32, #tpu.memory_space<vmem>>, vector<32x64xf32>
    %cst = arith.constant dense<0.000000e+00> : vector<8x64xf32>
    %4 = tpu.matmul %0, %3, %cst {dimension_numbers = #tpu.dot_dimension_numbers<[1], [0], [0], [1], [0, 0, 1, 1], [], []>} : vector<8x32xf32>, vector<32x64xf32>, vector<8x64xf32> -> vector<8x64xf32>
    %c0_7 = arith.constant 0 : index
    %c0_8 = arith.constant 0 : index
    %5 = vector.load %arg5[%c0_7, %c0_8] : memref<32x64xf32, #tpu.memory_space<vmem>>, vector<32x64xf32>
    %cst_9 = arith.constant dense<0.000000e+00> : vector<8x64xf32>
    %6 = tpu.matmul %1, %5, %cst_9 {dimension_numbers = #tpu.dot_dimension_numbers<[1], [0], [0], [1], [0, 0, 1, 1], [], []>} : vector<8x32xf32>, vector<32x64xf32>, vector<8x64xf32> -> vector<8x64xf32>
    %c0_10 = arith.constant 0 : index
    %c0_11 = arith.constant 0 : index
    %7 = vector.load %arg6[%c0_10, %c0_11] : memref<32x64xf32, #tpu.memory_space<vmem>>, vector<32x64xf32>
    %cst_12 = arith.constant dense<0.000000e+00> : vector<8x64xf32>
    %8 = tpu.matmul %2, %7, %cst_12 {dimension_numbers = #tpu.dot_dimension_numbers<[1], [0], [0], [1], [0, 0, 1, 1], [], []>} : vector<8x32xf32>, vector<32x64xf32>, vector<8x64xf32> -> vector<8x64xf32>
    %9 = vector.extract_strided_slice %4 {offsets = [0, 0], sizes = [8, 16], strides = [1, 1]} : vector<8x64xf32> to vector<8x16xf32>
    %10 = vector.extract_strided_slice %6 {offsets = [0, 0], sizes = [8, 16], strides = [1, 1]} : vector<8x64xf32> to vector<8x16xf32>
    %11 = vector.extract_strided_slice %8 {offsets = [0, 0], sizes = [8, 16], strides = [1, 1]} : vector<8x64xf32> to vector<8x16xf32>
    %cst_13 = arith.constant dense<0.000000e+00> : vector<8x8xf32>
    %12 = tpu.matmul %9, %10, %cst_13 {dimension_numbers = #tpu.dot_dimension_numbers<[1], [1], [0], [0], [0, 0, 1, 0], [], []>} : vector<8x16xf32>, vector<8x16xf32>, vector<8x8xf32> -> vector<8x8xf32>
    %cst_14 = arith.constant 0.176776692 : f32
    %13 = vector.broadcast %cst_14 : f32 to vector<8x8xf32>
    %14 = arith.mulf %12, %13 : vector<8x8xf32>
    %cst_15 = arith.constant dense<0xFF800000> : vector<8xf32>
    %15 = vector.multi_reduction <maximumf>, %14, %cst_15 [0] : vector<8x8xf32> to vector<8xf32>
    %16 = vector.shape_cast %15 : vector<8xf32> to vector<1x8xf32>
    %17 = vector.broadcast %16 : vector<1x8xf32> to vector<8x8xf32>
    %18 = arith.subf %14, %17 : vector<8x8xf32>
    %19 = math.exp %18 : vector<8x8xf32>
    %cst_16 = arith.constant dense<0.000000e+00> : vector<8xf32>
    %20 = vector.multi_reduction <add>, %19, %cst_16 [0] : vector<8x8xf32> to vector<8xf32>
    %21 = vector.shape_cast %20 : vector<8xf32> to vector<1x8xf32>
    %22 = tpu.reciprocal %21 : vector<1x8xf32> -> vector<1x8xf32>
    %23 = vector.broadcast %22 : vector<1x8xf32> to vector<8x8xf32>
    %24 = arith.mulf %19, %23 : vector<8x8xf32>
    %c0_17 = arith.constant 0 : index
    %c0_18 = arith.constant 0 : index
    %c0_19 = arith.constant 0 : index
    %25 = vector.load %arg12[%c0_17, %c0_18, %c0_19] : memref<4x8x8xf32, #tpu.memory_space<vmem>>, vector<1x8x8xf32>
    %26 = vector.shape_cast %25 : vector<1x8x8xf32> to vector<8x8xf32>
    %27 = vector.shape_cast %24 : vector<8x8xf32> to vector<1x8x8xf32>
    tpu.vector_store %arg12[%c0_17, %c0_18, %c0_19], %27 {strides = array<i32>} : memref<4x8x8xf32, #tpu.memory_space<vmem>>, vector<1x8x8xf32>,
    %cst_20 = arith.constant dense<0.000000e+00> : vector<8x16xf32>
    %28 = tpu.matmul %24, %11, %cst_20 {dimension_numbers = #tpu.dot_dimension_numbers<[1], [0], [0], [1], [0, 0, 1, 1], [], []>} : vector<8x8xf32>, vector<8x16xf32>, vector<8x16xf32> -> vector<8x16xf32>
    %29 = vector.extract_strided_slice %4 {offsets = [0, 16], sizes = [8, 16], strides = [1, 1]} : vector<8x64xf32> to vector<8x16xf32>
    %30 = vector.extract_strided_slice %6 {offsets = [0, 16], sizes = [8, 16], strides = [1, 1]} : vector<8x64xf32> to vector<8x16xf32>
    %31 = vector.extract_strided_slice %8 {offsets = [0, 16], sizes = [8, 16], strides = [1, 1]} : vector<8x64xf32> to vector<8x16xf32>
    %cst_21 = arith.constant dense<0.000000e+00> : vector<8x8xf32>
    %32 = tpu.matmul %29, %30, %cst_21 {dimension_numbers = #tpu.dot_dimension_numbers<[1], [1], [0], [0], [0, 0, 1, 0], [], []>} : vector<8x16xf32>, vector<8x16xf32>, vector<8x8xf32> -> vector<8x8xf32>
    %cst_22 = arith.constant 0.176776692 : f32
    %33 = vector.broadcast %cst_22 : f32 to vector<8x8xf32>
    %34 = arith.mulf %32, %33 : vector<8x8xf32>
    %cst_23 = arith.constant dense<0xFF800000> : vector<8xf32>
    %35 = vector.multi_reduction <maximumf>, %34, %cst_23 [0] : vector<8x8xf32> to vector<8xf32>
    %36 = vector.shape_cast %35 : vector<8xf32> to vector<1x8xf32>
    %37 = vector.broadcast %36 : vector<1x8xf32> to vector<8x8xf32>
    %38 = arith.subf %34, %37 : vector<8x8xf32>
    %39 = math.exp %38 : vector<8x8xf32>
    %cst_24 = arith.constant dense<0.000000e+00> : vector<8xf32>
    %40 = vector.multi_reduction <add>, %39, %cst_24 [0] : vector<8x8xf32> to vector<8xf32>
    %41 = vector.shape_cast %40 : vector<8xf32> to vector<1x8xf32>
    %42 = tpu.reciprocal %41 : vector<1x8xf32> -> vector<1x8xf32>
    %43 = vector.broadcast %42 : vector<1x8xf32> to vector<8x8xf32>
    %44 = arith.mulf %39, %43 : vector<8x8xf32>
    %c1 = arith.constant 1 : index
    %c0_25 = arith.constant 0 : index
    %c0_26 = arith.constant 0 : index
    %45 = vector.load %arg12[%c1, %c0_25, %c0_26] : memref<4x8x8xf32, #tpu.memory_space<vmem>>, vector<1x8x8xf32>
    %46 = vector.shape_cast %45 : vector<1x8x8xf32> to vector<8x8xf32>
    %47 = vector.shape_cast %44 : vector<8x8xf32> to vector<1x8x8xf32>
    tpu.vector_store %arg12[%c1, %c0_25, %c0_26], %47 {strides = array<i32>} : memref<4x8x8xf32, #tpu.memory_space<vmem>>, vector<1x8x8xf32>,
    %cst_27 = arith.constant dense<0.000000e+00> : vector<8x16xf32>
    %48 = tpu.matmul %44, %31, %cst_27 {dimension_numbers = #tpu.dot_dimension_numbers<[1], [0], [0], [1], [0, 0, 1, 1], [], []>} : vector<8x8xf32>, vector<8x16xf32>, vector<8x16xf32> -> vector<8x16xf32>
    %49 = vector.extract_strided_slice %4 {offsets = [0, 32], sizes = [8, 16], strides = [1, 1]} : vector<8x64xf32> to vector<8x16xf32>
    %50 = vector.extract_strided_slice %6 {offsets = [0, 32], sizes = [8, 16], strides = [1, 1]} : vector<8x64xf32> to vector<8x16xf32>
    %51 = vector.extract_strided_slice %8 {offsets = [0, 32], sizes = [8, 16], strides = [1, 1]} : vector<8x64xf32> to vector<8x16xf32>
    %cst_28 = arith.constant dense<0.000000e+00> : vector<8x8xf32>
    %52 = tpu.matmul %49, %50, %cst_28 {dimension_numbers = #tpu.dot_dimension_numbers<[1], [1], [0], [0], [0, 0, 1, 0], [], []>} : vector<8x16xf32>, vector<8x16xf32>, vector<8x8xf32> -> vector<8x8xf32>
    %cst_29 = arith.constant 0.176776692 : f32
    %53 = vector.broadcast %cst_29 : f32 to vector<8x8xf32>
    %54 = arith.mulf %52, %53 : vector<8x8xf32>
    %cst_30 = arith.constant dense<0xFF800000> : vector<8xf32>
    %55 = vector.multi_reduction <maximumf>, %54, %cst_30 [0] : vector<8x8xf32> to vector<8xf32>
    %56 = vector.shape_cast %55 : vector<8xf32> to vector<1x8xf32>
    %57 = vector.broadcast %56 : vector<1x8xf32> to vector<8x8xf32>
    %58 = arith.subf %54, %57 : vector<8x8xf32>
    %59 = math.exp %58 : vector<8x8xf32>
    %cst_31 = arith.constant dense<0.000000e+00> : vector<8xf32>
    %60 = vector.multi_reduction <add>, %59, %cst_31 [0] : vector<8x8xf32> to vector<8xf32>
    %61 = vector.shape_cast %60 : vector<8xf32> to vector<1x8xf32>
    %62 = tpu.reciprocal %61 : vector<1x8xf32> -> vector<1x8xf32>
    %63 = vector.broadcast %62 : vector<1x8xf32> to vector<8x8xf32>
    %64 = arith.mulf %59, %63 : vector<8x8xf32>
    %c2 = arith.constant 2 : index
    %c0_32 = arith.constant 0 : index
    %c0_33 = arith.constant 0 : index
    %65 = vector.load %arg12[%c2, %c0_32, %c0_33] : memref<4x8x8xf32, #tpu.memory_space<vmem>>, vector<1x8x8xf32>
    %66 = vector.shape_cast %65 : vector<1x8x8xf32> to vector<8x8xf32>
    %67 = vector.shape_cast %64 : vector<8x8xf32> to vector<1x8x8xf32>
    tpu.vector_store %arg12[%c2, %c0_32, %c0_33], %67 {strides = array<i32>} : memref<4x8x8xf32, #tpu.memory_space<vmem>>, vector<1x8x8xf32>,
    %cst_34 = arith.constant dense<0.000000e+00> : vector<8x16xf32>
    %68 = tpu.matmul %64, %51, %cst_34 {dimension_numbers = #tpu.dot_dimension_numbers<[1], [0], [0], [1], [0, 0, 1, 1], [], []>} : vector<8x8xf32>, vector<8x16xf32>, vector<8x16xf32> -> vector<8x16xf32>
    %69 = vector.extract_strided_slice %4 {offsets = [0, 48], sizes = [8, 16], strides = [1, 1]} : vector<8x64xf32> to vector<8x16xf32>
    %70 = vector.extract_strided_slice %6 {offsets = [0, 48], sizes = [8, 16], strides = [1, 1]} : vector<8x64xf32> to vector<8x16xf32>
    %71 = vector.extract_strided_slice %8 {offsets = [0, 48], sizes = [8, 16], strides = [1, 1]} : vector<8x64xf32> to vector<8x16xf32>
    %cst_35 = arith.constant dense<0.000000e+00> : vector<8x8xf32>
    %72 = tpu.matmul %69, %70, %cst_35 {dimension_numbers = #tpu.dot_dimension_numbers<[1], [1], [0], [0], [0, 0, 1, 0], [], []>} : vector<8x16xf32>, vector<8x16xf32>, vector<8x8xf32> -> vector<8x8xf32>
    %cst_36 = arith.constant 0.176776692 : f32
    %73 = vector.broadcast %cst_36 : f32 to vector<8x8xf32>
    %74 = arith.mulf %72, %73 : vector<8x8xf32>
    %cst_37 = arith.constant dense<0xFF800000> : vector<8xf32>
    %75 = vector.multi_reduction <maximumf>, %74, %cst_37 [0] : vector<8x8xf32> to vector<8xf32>
    %76 = vector.shape_cast %75 : vector<8xf32> to vector<1x8xf32>
    %77 = vector.broadcast %76 : vector<1x8xf32> to vector<8x8xf32>
    %78 = arith.subf %74, %77 : vector<8x8xf32>
    %79 = math.exp %78 : vector<8x8xf32>
    %cst_38 = arith.constant dense<0.000000e+00> : vector<8xf32>
    %80 = vector.multi_reduction <add>, %79, %cst_38 [0] : vector<8x8xf32> to vector<8xf32>
    %81 = vector.shape_cast %80 : vector<8xf32> to vector<1x8xf32>
    %82 = tpu.reciprocal %81 : vector<1x8xf32> -> vector<1x8xf32>
    %83 = vector.broadcast %82 : vector<1x8xf32> to vector<8x8xf32>
    %84 = arith.mulf %79, %83 : vector<8x8xf32>
    %c3 = arith.constant 3 : index
    %c0_39 = arith.constant 0 : index
    %c0_40 = arith.constant 0 : index
    %85 = vector.load %arg12[%c3, %c0_39, %c0_40] : memref<4x8x8xf32, #tpu.memory_space<vmem>>, vector<1x8x8xf32>
    %86 = vector.shape_cast %85 : vector<1x8x8xf32> to vector<8x8xf32>
    %87 = vector.shape_cast %84 : vector<8x8xf32> to vector<1x8x8xf32>
    tpu.vector_store %arg12[%c3, %c0_39, %c0_40], %87 {strides = array<i32>} : memref<4x8x8xf32, #tpu.memory_space<vmem>>, vector<1x8x8xf32>,
    %cst_41 = arith.constant dense<0.000000e+00> : vector<8x16xf32>
    %88 = tpu.matmul %84, %71, %cst_41 {dimension_numbers = #tpu.dot_dimension_numbers<[1], [0], [0], [1], [0, 0, 1, 1], [], []>} : vector<8x8xf32>, vector<8x16xf32>, vector<8x16xf32> -> vector<8x16xf32>
    %89 = tpu.concatenate %28, %48, %68, %88 in 1 : vector<8x16xf32>, vector<8x16xf32>, vector<8x16xf32>, vector<8x16xf32> -> vector<8x64xf32>
    %c0_42 = arith.constant 0 : index
    %c0_43 = arith.constant 0 : index
    %90 = vector.load %arg7[%c0_42, %c0_43] : memref<32x64xf32, #tpu.memory_space<vmem>>, vector<32x64xf32>
    %cst_44 = arith.constant dense<0.000000e+00> : vector<8x32xf32>
    %91 = tpu.matmul %89, %90, %cst_44 {dimension_numbers = #tpu.dot_dimension_numbers<[1], [1], [0], [0], [0, 0, 1, 0], [], []>} : vector<8x64xf32>, vector<32x64xf32>, vector<8x32xf32> -> vector<8x32xf32>
    %c0_45 = arith.constant 0 : index
    %c0_46 = arith.constant 0 : index
    %92 = vector.load %arg8[%c0_45, %c0_46] : memref<1x32xf32, #tpu.memory_space<vmem>>, vector<1x32xf32>
    %93 = vector.broadcast %92 : vector<1x32xf32> to vector<8x32xf32>
    %94 = arith.addf %91, %93 : vector<8x32xf32>
    %95 = arith.addf %94, %0 : vector<8x32xf32>
    %cst_47 = arith.constant dense<0.000000e+00> : vector<8xf32>
    %96 = vector.multi_reduction <add>, %95, %cst_47 [1] : vector<8x32xf32> to vector<8xf32>
    %97 = vector.shape_cast %96 : vector<8xf32> to vector<8x1xf32>
    %cst_48 = arith.constant 3.200000e+01 : f32
    %98 = vector.broadcast %cst_48 : f32 to vector<8x1xf32>
    %99 = arith.divf %97, %98 : vector<8x1xf32>
    %100 = vector.broadcast %99 : vector<8x1xf32> to vector<8x32xf32>
    %101 = arith.subf %95, %100 : vector<8x32xf32>
    %102 = arith.mulf %101, %101 : vector<8x32xf32>
    %cst_49 = arith.constant dense<0.000000e+00> : vector<8xf32>
    %103 = vector.multi_reduction <add>, %102, %cst_49 [1] : vector<8x32xf32> to vector<8xf32>
    %104 = vector.shape_cast %103 : vector<8xf32> to vector<8x1xf32>
    %cst_50 = arith.constant 3.200000e+01 : f32
    %105 = vector.broadcast %cst_50 : f32 to vector<8x1xf32>
    %106 = arith.divf %104, %105 : vector<8x1xf32>
    %107 = vector.broadcast %99 : vector<8x1xf32> to vector<8x32xf32>
    %108 = arith.subf %95, %107 : vector<8x32xf32>
    %cst_51 = arith.constant 9.99999974E-6 : f32
    %109 = vector.broadcast %cst_51 : f32 to vector<8x1xf32>
    %110 = arith.addf %106, %109 : vector<8x1xf32>
    %111 = math.rsqrt %110 : vector<8x1xf32>
    %112 = vector.broadcast %111 : vector<8x1xf32> to vector<8x32xf32>
    %113 = arith.mulf %108, %112 : vector<8x32xf32>
    %c0_52 = arith.constant 0 : index
    %c0_53 = arith.constant 0 : index
    %114 = vector.load %arg9[%c0_52, %c0_53] : memref<1x32xf32, #tpu.memory_space<vmem>>, vector<1x32xf32>
    %115 = vector.broadcast %114 : vector<1x32xf32> to vector<8x32xf32>
    %116 = arith.mulf %113, %115 : vector<8x32xf32>
    %c0_54 = arith.constant 0 : index
    %c0_55 = arith.constant 0 : index
    %117 = vector.load %arg10[%c0_54, %c0_55] : memref<1x32xf32, #tpu.memory_space<vmem>>, vector<1x32xf32>
    %118 = vector.broadcast %117 : vector<1x32xf32> to vector<8x32xf32>
    %119 = arith.addf %116, %118 : vector<8x32xf32>
    %c0_56 = arith.constant 0 : index
    %c0_57 = arith.constant 0 : index
    %120 = vector.load %arg11[%c0_56, %c0_57] : memref<8x32xf32, #tpu.memory_space<vmem>>, vector<8x32xf32>
    tpu.vector_store %arg11[%c0_56, %c0_57], %119 {strides = array<i32>} : memref<8x32xf32, #tpu.memory_space<vmem>>, vector<8x32xf32>,
    return
  }
  func.func @transform_0(%arg0: i32) -> (i32, i32) {
    %c0_i32 = arith.constant 0 : i32
    %c0_i32_0 = arith.constant 0 : i32
    %c0_i32_1 = arith.constant 0 : i32
    return %c0_i32, %c0_i32_0 : i32, i32
  }
  func.func @transform_1(%arg0: i32) -> (i32, i32) {
    %c0_i32 = arith.constant 0 : i32
    %c0_i32_0 = arith.constant 0 : i32
    %c0_i32_1 = arith.constant 0 : i32
    return %c0_i32, %c0_i32_0 : i32, i32
  }
  func.func @transform_2(%arg0: i32) -> (i32, i32) {
    %c0_i32 = arith.constant 0 : i32
    %c0_i32_0 = arith.constant 0 : i32
    %c0_i32_1 = arith.constant 0 : i32
    return %c0_i32, %c0_i32_0 : i32, i32
  }
  func.func @transform_3(%arg0: i32) -> (i32, i32) {
    %c0_i32 = arith.constant 0 : i32
    %c0_i32_0 = arith.constant 0 : i32
    %c0_i32_1 = arith.constant 0 : i32
    return %c0_i32, %c0_i32_0 : i32, i32
  }
  func.func @transform_4(%arg0: i32) -> (i32, i32) {
    %c0_i32 = arith.constant 0 : i32
    %c0_i32_0 = arith.constant 0 : i32
    %c0_i32_1 = arith.constant 0 : i32
    return %c0_i32, %c0_i32_0 : i32, i32
  }
  func.func @transform_5(%arg0: i32) -> (i32, i32) {
    %c0_i32 = arith.constant 0 : i32
    %c0_i32_0 = arith.constant 0 : i32
    %c0_i32_1 = arith.constant 0 : i32
    return %c0_i32, %c0_i32_0 : i32, i32
  }
  func.func @transform_6(%arg0: i32) -> (i32, i32) {
    %c0_i32 = arith.constant 0 : i32
    %c0_i32_0 = arith.constant 0 : i32
    %c0_i32_1 = arith.constant 0 : i32
    return %c0_i32, %c0_i32_0 : i32, i32
  }
  func.func @transform_7(%arg0: i32) -> (i32, i32) {
    %c0_i32 = arith.constant 0 : i32
    %c0_i32_0 = arith.constant 0 : i32
    %c0_i32_1 = arith.constant 0 : i32
    return %c0_i32, %c0_i32_0 : i32, i32
  }
  func.func @transform_8(%arg0: i32) -> (i32, i32) {
    %c0_i32 = arith.constant 0 : i32
    %c0_i32_0 = arith.constant 0 : i32
    %c0_i32_1 = arith.constant 0 : i32
    return %c0_i32, %c0_i32_0 : i32, i32
  }
  func.func @transform_9(%arg0: i32) -> (i32, i32) {
    %c0_i32 = arith.constant 0 : i32
    %c0_i32_0 = arith.constant 0 : i32
    %c0_i32_1 = arith.constant 0 : i32
    return %c0_i32, %c0_i32_0 : i32, i32
  }
  func.func @transform_10(%arg0: i32) -> (i32, i32) {
    %c0_i32 = arith.constant 0 : i32
    %c0_i32_0 = arith.constant 0 : i32
    %c0_i32_1 = arith.constant 0 : i32
    return %c0_i32, %c0_i32_0 : i32, i32
  }
  func.func @transform_11(%arg0: i32) -> (i32, i32, i32) {
    %c0_i32 = arith.constant 0 : i32
    %c0_i32_0 = arith.constant 0 : i32
    %c0_i32_1 = arith.constant 0 : i32
    %c0_i32_2 = arith.constant 0 : i32
    return %c0_i32, %c0_i32_0, %c0_i32_1 : i32, i32, i32
  }
}

</mosaic_0001>

<bundles_post_ra>
// kernel: tpu_custom_call.1
= control target key start
LH: loop header
LB: loop body
LE: loop exit
PB: predicated region body
PF: predicated region fallthrough
CT: control target
= control target key end

     0   :  { %17 = vsyncpa [#allocation3], 0  ;;  %s1178_s0 = inlined_call_operand.hbm [shape: f32[8,32], index: 0, kind: input, shape index: {}]   ;;  %s1179_s1 = inlined_call_operand.hbm [shape: f32[8,32], index: 1, kind: input, shape index: {}]   ;;  %s1180_s2 = inlined_call_operand.hbm [shape: f32[8,32], index: 2, kind: input, shape index: {}]   ;;  %s1181_s3 = inlined_call_operand.hbm [shape: f32[32,64], index: 3, kind: input, shape index: {}]   ;;  %s1182_s4 = inlined_call_operand.hbm [shape: f32[32,64], index: 4, kind: input, shape index: {}]   ;;  %s1183_s5 = inlined_call_operand.hbm [shape: f32[32,64], index: 5, kind: input, shape index: {}]   ;;  %s1184_s6 = inlined_call_operand.hbm [shape: f32[32,64], index: 6, kind: input, shape index: {}]   ;;  %s1185_s7 = inlined_call_operand.vmem [shape: f32[1,32], index: 7, kind: input, shape index: {}]   ;;  %s1186_s8 = inlined_call_operand.vmem [shape: f32[1,32], index: 8, kind: input, shape index: {}]   ;;  %s1187_s9 = inlined_call_operand.vmem [shape: f32[1,32], index: 9, kind: input, shape index: {}]   ;;  %s1188_s10 = inlined_call_operand.hbm [shape: f32[8,32], index: 10, kind: output, shape index: {0}]   ;;  %s1189_s11 = inlined_call_operand.hbm [shape: f32[4,8,8], index: 11, kind: output, shape index: {1}]  }
   0x1   :  { %18 = vsyncpa [#allocation6], 0 }
   0x2   :  { %19 = vsyncpa [#allocation9], 0 }
   0x3   :  { %20 = vsyncpa [#allocation12], 0 }
   0x4   :  { %21 = vsyncpa [#allocation4], 0  ;;  %s39_s19 = sshll.u32 %s1179_s1, 4  ;;  %s40_s19 = int_to_ptr.hbm [resolvable:$true] %s39_s19 }
   0x5   :  { %22 = vsyncpa [#allocation16], 0  ;;  %s1008_s20 = smov [#allocation5]   ;;  %s60_s24 = sshll.u32 %s1181_s3, 4  ;;  %s61_s24 = int_to_ptr.hbm [resolvable:$true] %s60_s24 }
   0x6   :  { %s41_s21 = sshll.u32 %s1008_s20, 4  ;;  %s1009_s25 = smov [#allocation8]   ;;  %s42_s21 = int_to_ptr.vmem [resolvable:$true] %s41_s21 }
   0x7   :  { %44 = dma.hbm_to_vmem [thread:$0]  %s40_s19, 128, %s42_s21, [#allocation6]  }
   0x8   :  { %s62_s26 = sshll.u32 %s1009_s25, 4  ;;  %s1010_s27 = smov 128   ;;  %s63_s26 = int_to_ptr.vmem [resolvable:$true] %s62_s26 }
   0x9   :  { %s1011_s28 = smov 8   ;;  %s86_s30 = sshll.u32 %s1183_s5, 4  ;;  %s87_s30 = int_to_ptr.hbm [resolvable:$true] %s86_s30 }
   0xa   :  { %68 = dma.hbm_to_vmem [thread:$0]  %s61_s24, 512, %s63_s26, [#allocation9], %s1010_s27, %s1010_s27, %s1011_s28  }
   0xb   :  { %s1012_s12 = smov [#allocation11]   ;;  %s28_s15 = sshll.u32 %s1178_s0, 4  ;;  %s29_s15 = int_to_ptr.hbm [resolvable:$true] %s28_s15 }
   0xc   :  { %s88_s13 = sshll.u32 %s1012_s12, 4  ;;  %s1013_s16 = smov [#allocation2]   ;;  %s89_s13 = int_to_ptr.vmem [resolvable:$true] %s88_s13 }
   0xd   :  { %94 = dma.hbm_to_vmem [thread:$0]  %s87_s30, 512, %s89_s13, [#allocation12], %s1010_s27, %s1010_s27, %s1011_s28  }
   0xe   :  { %s30_s17 = sshll.u32 %s1013_s16, 4  ;;  %s50_s20 = sshll.u32 %s1180_s2, 4  ;;  %s31_s17 = int_to_ptr.vmem [resolvable:$true] %s30_s17  ;;  %s51_s20 = int_to_ptr.hbm [resolvable:$true] %s50_s20 }
   0xf   :  { %33 = dma.hbm_to_vmem [thread:$0]  %s29_s15, 128, %s31_s17, [#allocation3]  }
  0x10   :  { %s73_s22 = sshll.u32 %s1182_s4, 4  ;;  %s1014_s23 = smov [#allocation7]   ;;  %s74_s22 = int_to_ptr.hbm [resolvable:$true] %s73_s22 }
  0x11   :  { %s52_s0 = sshll.u32 %s1014_s23, 4  ;;  %s1015_s24 = smov [#allocation10]   ;;  %s53_s0 = int_to_ptr.vmem [resolvable:$true] %s52_s0 }
  0x12   :  { %55 = dma.hbm_to_vmem [thread:$0]  %s51_s20, 128, %s53_s0, [#allocation6]  }
  0x13   :  { %s75_s25 = sshll.u32 %s1015_s24, 4  ;;  %s99_s29 = sshll.u32 %s1184_s6, 4  ;;  %s76_s25 = int_to_ptr.vmem [resolvable:$true] %s75_s25  ;;  %s100_s29 = int_to_ptr.hbm [resolvable:$true] %s99_s29 }
  0x14   :  { %81 = dma.hbm_to_vmem [thread:$0]  %s74_s22, 512, %s76_s25, [#allocation9], %s1010_s27, %s1010_s27, %s1011_s28  }
  0x15   :  { %s1016_s2 = smov [#allocation13]  }
  0x16   :  { %s101_s30 = sshll.u32 %s1016_s2, 4  ;;  %s102_s30 = int_to_ptr.vmem [resolvable:$true] %s101_s30 }
  0x17   :  { %107 = dma.hbm_to_vmem [thread:$0]  %s100_s29, 512, %s102_s30, [#allocation12], %s1010_s27, %s1010_s27, %s1011_s28  }
  0x18   :  { %996 = dma.done.wait [#allocation3], 128  }
  0x19   :  { %997 = vsyncadd [#allocation3], 4294967168 }
  0x1a   :  { %998 = dma.done.wait [#allocation6], 256  }
  0x1b   :  { %999 = vsyncadd [#allocation6], 4294967040 }
  0x1c   :  { %1000 = dma.done.wait [#allocation9], 1024  }
  0x1d   :  { %1001 = vsyncadd [#allocation9], 4294966272 }
  0x1e   :  { %1002 = dma.done.wait [#allocation12], 1024  }
  0x1f   :  { %1003 = vsyncadd [#allocation12], 4294966272  ;;  %v176_v0 = vld [vmem:[#allocation10 + $0x18] sm:$0xff]  ;;  %v175_v1 = vld [vmem:[#allocation10 + $0x10] sm:$0xff]  ;;  %vm149_vm0 = vcmask 261120   ;;  %vm227_vm1 = vcmask 130048  }
  0x20   :  { %v148_v2 = vld [vmem:[#allocation8 + $0x18] sm:$0xff]  ;;  %192 = vmatpush.msra.mxu1 %v176_v0  ;;  %v147_v3 = vld [vmem:[#allocation8 + $0x10] sm:$0xff]  ;;  %v174_v4 = vld [vmem:[#allocation10 + $0x8] sm:$0xff]  ;;  %s1017_s4 = smov 80   ;;  %s1018_s6 = smov 112   ;;  %vm255_vm2 = vcmask 64512  }
  0x21   :  { %165 = vmatpush.msra.mxu0 %v148_v2  ;;  %v146_v5 = vld [vmem:[#allocation8 + $0x8] sm:$0xff]  ;;  %v203_v6 = vld [vmem:[#allocation11 + $0x18] sm:$0xff]  ;;  %v202_v7 = vld [vmem:[#allocation11 + $0x10] sm:$0xff]  ;;  %s1019_s12 = smov 96   ;;  %s1020_s13 = smov 16  }
  0x22   :  { %193 = vmatpush.msra.mxu1 %v175_v1  ;;  %v173_v8 = vld [vmem:[#allocation10] sm:$0xff]  ;;  %v143_v9 = vld [vmem:[#allocation5] sm:$0xff]  ;;  %219 = vmatpush.msra.mxu2 %v203_v6  ;;  %v1119_v11 = vld [vmem:[#allocation2] sm:$0xff]  ;;  %s1021_s3 = smov 48   ;;  %s1022_s14 = smov 32  }
  0x23   :  { %166 = vmatpush.msra.mxu0 %v147_v3  ;;  %v145_v10 = vld [vmem:[#allocation8] sm:$0xff]  ;;  %v201_v12 = vld [vmem:[#allocation11 + $0x8] sm:$0xff]  ;;  %v144_v14 = vld [vmem:[#allocation7] sm:$0xff]  ;;  %s698_s20 = sshll.u32 %s1189_s11, 4  ;;  %s1025_s21 = smov [#allocation14]   ;;  %s699_s20 = int_to_ptr.hbm [resolvable:$true] %s698_s20 }
  0x24   :  { %194 = vmatpush.msra.mxu1 %v174_v4  ;;  %220 = vmatpush.msra.mxu2 %v202_v7  ;;  %v200_v13 = vld [vmem:[#allocation11] sm:$0xff]  ;;  %s686_s22 = sshll.u32 %s1025_s21, 4  ;;  %s688_s24 = sshll.u32 %s1188_s10, 4  ;;  %s687_s22 = int_to_ptr.vmem [resolvable:$true] %s686_s22  ;;  %s689_s24 = int_to_ptr.hbm [resolvable:$true] %s688_s24 }
  0x25   :  { %167 = vmatpush.msra.mxu0 %v146_v5 }
  0x26   :  { %195 = vmatpush.msra.mxu1 %v173_v8  ;;  %221 = vmatpush.msra.mxu2 %v201_v12 }
  0x27   :  { %168 = vmatpush.msra.mxu0 %v145_v10  ;;  %720 = vmatmul.msk.f32.vlgmr.msra.gmra.mxu1 %vm149_vm0, %v143_v9 }
  0x28   :  { %719 = vmatmul.msk.f32.vlgmr.msra.gmra.mxu0 %vm149_vm0, %v1119_v11  ;;  %222 = vmatpush.msra.mxu2 %v200_v13 }
  0x29   :  { %721 = vmatmul.msk.f32.vlgmr.msra.gmra.mxu2 %vm149_vm0, %v144_v14 }
  0xa4   :  { %v197_v15 = vpop.f32.mrf.mxu1 }
  0xa5   :  { %493 = vrot.lane.b32.xlu2 %v197_v15, %s1017_s4  ;;  %314 = vrot.lane.b32.xlu1 %v197_v15, %s1018_s6  ;;  %v170_v16 = vpop.f32.mrf.mxu0 }
  0xa6   :  { %404 = vrot.lane.b32.xlu0 %v197_v15, %s1019_s12  ;;  %722 = vmatpush.xpose.msk.msra.mxu3 %vm227_vm1, %v197_v15 }
  0xa9   :  { %723 = vmatmul.msk.f32.vlgmr.msra.gmra.mxu3 %vm227_vm1, %v170_v16 }
  0xac   :  { %v224_v17 = vpop.f32.mrf.mxu2 }
  0xad   :  { %491 = vrot.lane.b32.xlu2 %v170_v16, %s1017_s4  ;;  %312 = vrot.lane.b32.xlu1 %v170_v16, %s1018_s6 }
  0xae   :  { %402 = vrot.lane.b32.xlu0 %v170_v16, %s1019_s12  ;;  %307 = vmatpush.msrb.mxu3 %v224_v17 }
  0xb5   :  { %554 = vrot.lane.b32.xlu2 %v224_v17, %s1017_s4  ;;  %465 = vrot.lane.b32.xlu1 %v224_v17, %s1019_s12 }
  0xb6   :  { %376 = vrot.lane.b32.xlu0 %v224_v17, %s1018_s6 }
  0xff   :  { %v494_v19 = vpop.permute.xlu2 %493 }
 0x107   :  { %v492_v22 = vpop.permute.xlu2 %491 }
 0x10f   :  { %v555_v58 = vpop.permute.xlu2 %554 }
 0x117   :  { %v315_v18 = vpop.permute.xlu1 %314 }
 0x118   :  { %v405_v20 = vpop.permute.xlu0 %404  ;;  %725 = vmatpush.xpose.msk.msrb.mxu0 %vm227_vm1, %v315_v18 }
 0x119   :  { %728 = vmatpush.xpose.msk.msra.mxu3 %vm227_vm1, %v405_v20 }
 0x11c   :  { %731 = vmatpush.xpose.msk.msra.mxu0 %vm227_vm1, %v494_v19 }
 0x11f   :  { %v313_v21 = vpop.permute.xlu1 %312 }
 0x120   :  { %726 = vmatmul.msk.f32.vlgmr.msrb.gmra.mxu0 %vm227_vm1, %v313_v21  ;;  %v403_v53 = vpop.permute.xlu0 %402 }
 0x127   :  { %v466_v17 = vpop.permute.xlu1 %465 }
 0x128   :  { %732 = vmatmul.msk.f32.vlgmr.msra.gmra.mxu0 %vm227_vm1, %v492_v22  ;;  %v377_v56 = vpop.permute.xlu0 %376 }
 0x129   :  { %397 = vmatpush.msrb.mxu1 %v377_v56 }
 0x12b   :  { %575 = vmatpush.msra.mxu1 %v555_v58 }
 0x12c   :  { %v251_v23 = vpop.f32.mrf.mxu3 }
 0x12d   :  { %v254_v24 = vmul.f32 0.17677669, %v251_v23 }
 0x12f   :  { %v256_v25 = vsel %vm255_vm2, %v254_v24, -inf }
 0x130   :  { %v257_v26 = vrot.slane %v256_v25, 4 }
 0x132   :  { %v258_v27 = vmax.f32 %v256_v25, %v257_v26 }
 0x134   :  { %v259_v28 = vrot.slane %v258_v27, 2 }
 0x136   :  { %v260_v29 = vmax.f32 %v258_v27, %v259_v28 }
 0x138   :  { %v261_v30 = vrot.slane %v260_v29, 1 }
 0x13a   :  { %v262_v31 = vmax.f32 %v260_v29, %v261_v30 }
 0x13c   :  { %v263_v32 = vsub.f32 %v254_v24, %v262_v31 }
 0x13e   :  { %v264_v33 = vmul.f32 1.442695, %v263_v32 }
 0x140   :  { %760 = vpow2.f32 %v264_v33 }
 0x146   :  { %v761_v34 = vpop.eup %760 }
 0x147   :  { %v266_v35 = vsel %vm255_vm2, %v761_v34, 0.0 }
 0x148   :  { %v267_v36 = vrot.slane %v266_v35, 4 }
 0x14a   :  { %v268_v37 = vadd.f32 %v267_v36, %v266_v35 }
 0x14c   :  { %v269_v38 = vrot.slane %v268_v37, 2 }
 0x14e   :  { %v270_v39 = vadd.f32 %v269_v38, %v268_v37 }
 0x150   :  { %v271_v40 = vrot.slane %v270_v39, 1 }
 0x152   :  { %v272_v41 = vadd.f32 %v271_v40, %v270_v39 }
 0x154   :  { %762 = vrcp.f32 %v272_v41  ;;  %v284_v45 = vand.u32 2147483648, %v272_v41  ;;  %v282_v47 = vand.u32 2147483647, %v272_v41  ;;  %vm278_vm4 = vweird.f32 %v272_v41 }
 0x156   :  { %v285_v49 = vor.u32 1.1754944e-38, %v284_v45  ;;  %vm283_vm6 = vcmp.eq.f32.partialorder %v282_v47, 8.507059e+37 }
 0x15a   :  { %v763_v42 = vpop.eup %762 }
 0x15b   :  { %v274_v43 = vmul.f32 %v763_v42, %v272_v41  ;;  %vm279_vm3 = vweird.f32 %v763_v42 }
 0x15c   :  { %vm280_vm5 = vmor %vm278_vm4, %vm279_vm3 }
 0x15d   :  { %v275_v44 = vsub.f32 1.0, %v274_v43 }
 0x15f   :  { %v276_v46 = vmul.f32 %v763_v42, %v275_v44 }
 0x161   :  { %v277_v48 = vadd.f32 %v763_v42, %v276_v46 }
 0x163   :  { %v281_v50 = vsel %vm280_vm5, %v763_v42, %v277_v48 }
 0x164   :  { %v286_v51 = vsel %vm283_vm6, %v285_v49, %v281_v50  ;;  %vm604_vm6 = vcmask 523264  }
 0x165   :  { %v287_v52 = vmul.f32 %v761_v34, %v286_v51 }
 0x167   :  { %724 = vmatmul.msk.f32.vlgmr.msrb.gmra.mxu3 %vm255_vm2, %v287_v52  ;;  %288 = vst.msk [vmem:[#allocation15] sm:$0xff] %vm255_vm2, %v287_v52 }
 0x168   :  { %486 = vmatpush.msrb.mxu3 %v466_v17 }
 0x16f   :  { %729 = vmatmul.msk.f32.vlgmr.msra.gmra.mxu3 %vm227_vm1, %v403_v53 }
 0x19d   :  { %v337_v54 = vpop.f32.mrf.mxu0 }
 0x19e   :  { %v340_v55 = vmul.f32 0.17677669, %v337_v54 }
 0x1a0   :  { %v341_v57 = vsel %vm255_vm2, %v340_v55, -inf }
 0x1a1   :  { %v342_v59 = vrot.slane %v341_v57, 4 }
 0x1a3   :  { %v343_v60 = vmax.f32 %v341_v57, %v342_v59 }
 0x1a5   :  { %v344_v61 = vrot.slane %v343_v60, 2  ;;  %v516_v62 = vpop.f32.mrf.mxu0 }
 0x1a6   :  { %v519_v63 = vmul.f32 0.17677669, %v516_v62 }
 0x1a7   :  { %v345_v0 = vmax.f32 %v343_v60, %v344_v61 }
 0x1a8   :  { %v520_v1 = vsel %vm255_vm2, %v519_v63, -inf }
 0x1a9   :  { %v346_v2 = vrot.slane %v345_v0, 1  ;;  %v521_v3 = vrot.slane %v520_v1, 4 }
 0x1ab   :  { %v347_v4 = vmax.f32 %v345_v0, %v346_v2  ;;  %v522_v5 = vmax.f32 %v520_v1, %v521_v3 }
 0x1ad   :  { %v348_v6 = vsub.f32 %v340_v55, %v347_v4  ;;  %v523_v7 = vrot.slane %v522_v5, 2 }
 0x1af   :  { %v349_v8 = vmul.f32 1.442695, %v348_v6  ;;  %v524_v9 = vmax.f32 %v522_v5, %v523_v7 }
 0x1b1   :  { %764 = vpow2.f32 %v349_v8  ;;  %v525_v10 = vrot.slane %v524_v9, 1 }
 0x1b3   :  { %v526_v12 = vmax.f32 %v524_v9, %v525_v10 }
 0x1b5   :  { %v527_v13 = vsub.f32 %v519_v63, %v526_v12 }
 0x1b7   :  { %v765_v14 = vpop.eup %764  ;;  %v528_v15 = vmul.f32 1.442695, %v527_v13 }
 0x1b8   :  { %v351_v16 = vsel %vm255_vm2, %v765_v14, 0.0 }
 0x1b9   :  { %v352_v18 = vrot.slane %v351_v16, 4  ;;  %766 = vpow2.f32 %v528_v15 }
 0x1bb   :  { %v353_v19 = vadd.f32 %v352_v18, %v351_v16 }
 0x1bd   :  { %v354_v20 = vrot.slane %v353_v19, 2 }
 0x1bf   :  { %v767_v21 = vpop.eup %766  ;;  %v355_v22 = vadd.f32 %v354_v20, %v353_v19 }
 0x1c0   :  { %v530_v23 = vsel %vm255_vm2, %v767_v21, 0.0 }
 0x1c1   :  { %v356_v24 = vrot.slane %v355_v22, 1  ;;  %v531_v25 = vrot.slane %v530_v23, 4 }
 0x1c3   :  { %v357_v26 = vadd.f32 %v356_v24, %v355_v22  ;;  %v532_v27 = vadd.f32 %v531_v25, %v530_v23  ;;  %v599_v24 = vld [vmem:[#allocation13 + $0x18] sm:$0xff]  ;;  %v598_v25 = vld [vmem:[#allocation13 + $0x10] sm:$0xff] }
 0x1c4   :  { %734 = vmatpush.xpose.msk.msrb.mxu2 %vm604_vm6, %v599_v24 }
 0x1c5   :  { %768 = vrcp.f32 %v357_v26  ;;  %v533_v28 = vrot.slane %v532_v27, 2  ;;  %v369_v35 = vand.u32 2147483648, %v357_v26  ;;  %v367_v37 = vand.u32 2147483647, %v357_v26 }
 0x1c6   :  { %vm363_vm8 = vweird.f32 %v357_v26 }
 0x1c7   :  { %v534_v29 = vadd.f32 %v533_v28, %v532_v27  ;;  %v370_v40 = vor.u32 1.1754944e-38, %v369_v35  ;;  %vm368_vm10 = vcmp.eq.f32.partialorder %v367_v37, 8.507059e+37  ;;  %v596_v28 = vld [vmem:[#allocation13] sm:$0xff]  ;;  %v757_v35 = vld [vmem:[%s1185_s7] ss:$0 sm:$0xff]  ;;  %s1024_s7 = smov [#allocation15]  }
 0x1c8   :  { %735 = vmatpush.xpose.msk.msrb.mxu2 %vm604_vm6, %v598_v25  ;;  %s696_s17 = sshll.u32 %s1024_s7, 4  ;;  %s697_s17 = int_to_ptr.vmem [resolvable:$true] %s696_s17 }
 0x1c9   :  { %v535_v30 = vrot.slane %v534_v29, 1 }
 0x1cb   :  { %v769_v31 = vpop.eup %768  ;;  %v536_v32 = vadd.f32 %v535_v30, %v534_v29 }
 0x1cc   :  { %v359_v33 = vmul.f32 %v769_v31, %v357_v26  ;;  %vm364_vm7 = vweird.f32 %v769_v31  ;;  %v597_v26 = vld [vmem:[#allocation13 + $0x8] sm:$0xff] }
 0x1cd   :  { %770 = vrcp.f32 %v536_v32  ;;  %vm365_vm9 = vmor %vm363_vm8, %vm364_vm7  ;;  %v548_v46 = vand.u32 2147483648, %v536_v32  ;;  %v546_v48 = vand.u32 2147483647, %v536_v32  ;;  %vm542_vm12 = vweird.f32 %v536_v32  ;;  %736 = vmatpush.xpose.msk.msrb.mxu2 %vm604_vm6, %v597_v26 }
 0x1ce   :  { %v360_v34 = vsub.f32 1.0, %v359_v33 }
 0x1cf   :  { %v549_v50 = vor.u32 1.1754944e-38, %v548_v46  ;;  %vm547_vm14 = vcmp.eq.f32.partialorder %v546_v48, 8.507059e+37 }
 0x1d0   :  { %v361_v36 = vmul.f32 %v769_v31, %v360_v34 }
 0x1d1   :  { %737 = vmatpush.xpose.msk.msrb.mxu2 %vm604_vm6, %v596_v28 }
 0x1d2   :  { %v362_v38 = vadd.f32 %v769_v31, %v361_v36 }
 0x1d3   :  { %v771_v39 = vpop.eup %770 }
 0x1d4   :  { %v538_v41 = vmul.f32 %v771_v39, %v536_v32  ;;  %v366_v42 = vsel %vm365_vm9, %v769_v31, %v362_v38  ;;  %vm543_vm11 = vweird.f32 %v771_v39 }
 0x1d5   :  { %v371_v43 = vsel %vm368_vm10, %v370_v40, %v366_v42  ;;  %vm544_vm13 = vmor %vm542_vm12, %vm543_vm11  ;;  %v1023_v40 = vmov 32.0  }
 0x1d6   :  { %v539_v44 = vsub.f32 1.0, %v538_v41  ;;  %v372_v45 = vmul.f32 %v765_v14, %v371_v43 }
 0x1d8   :  { %v540_v47 = vmul.f32 %v771_v39, %v539_v44  ;;  %727 = vmatmul.msk.f32.vlgmr.msrb.gmra.mxu1 %vm255_vm2, %v372_v45  ;;  %374 = vst.msk [vmem:[#allocation15 + $0x8] sm:$0xff] %vm255_vm2, %v372_v45 }
 0x1da   :  { %v541_v49 = vadd.f32 %v771_v39, %v540_v47 }
 0x1dc   :  { %v545_v51 = vsel %vm544_vm13, %v771_v39, %v541_v49 }
 0x1dd   :  { %v550_v52 = vsel %vm547_vm14, %v549_v50, %v545_v51 }
 0x1de   :  { %v551_v53 = vmul.f32 %v767_v21, %v550_v52 }
 0x1e0   :  { %553 = vst.msk [vmem:[#allocation15 + $0x18] sm:$0xff] %vm255_vm2, %v551_v53  ;;  %733 = vmatmul.msk.f32.vlgmr.msra.gmra.mxu1 %vm255_vm2, %v551_v53 }
 0x1ea   :  { %v309_v54 = vpop.f32.mrf.mxu3 }
 0x1f2   :  { %v427_v55 = vpop.f32.mrf.mxu3 }
 0x1f3   :  { %v430_v56 = vmul.f32 0.17677669, %v427_v55 }
 0x1f5   :  { %v431_v57 = vsel %vm255_vm2, %v430_v56, -inf }
 0x1f6   :  { %v432_v58 = vrot.slane %v431_v57, 4 }
 0x1f8   :  { %v433_v59 = vmax.f32 %v431_v57, %v432_v58 }
 0x1fa   :  { %v434_v60 = vrot.slane %v433_v59, 2 }
 0x1fc   :  { %v435_v61 = vmax.f32 %v433_v59, %v434_v60  ;;  %v758_v60 = vld [vmem:[%s1186_s8] ss:$0 sm:$0xff] }
 0x1fe   :  { %v436_v62 = vrot.slane %v435_v61, 1 }
 0x200   :  { %v437_v63 = vmax.f32 %v435_v61, %v436_v62 }
 0x202   :  { %v438_v0 = vsub.f32 %v430_v56, %v437_v63  ;;  %v759_v63 = vld [vmem:[%s1187_s9] ss:$0 sm:$0xff] }
 0x204   :  { %v439_v1 = vmul.f32 1.442695, %v438_v0 }
 0x206   :  { %772 = vpow2.f32 %v439_v1 }
 0x20c   :  { %v773_v2 = vpop.eup %772 }
 0x20d   :  { %v441_v3 = vsel %vm255_vm2, %v773_v2, 0.0 }
 0x20e   :  { %v442_v4 = vrot.slane %v441_v3, 4 }
 0x210   :  { %v443_v5 = vadd.f32 %v442_v4, %v441_v3 }
 0x212   :  { %v444_v6 = vrot.slane %v443_v5, 2 }
 0x214   :  { %v445_v7 = vadd.f32 %v444_v6, %v443_v5 }
 0x216   :  { %v446_v8 = vrot.slane %v445_v7, 1 }
 0x218   :  { %v447_v9 = vadd.f32 %v446_v8, %v445_v7 }
 0x21a   :  { %774 = vrcp.f32 %v447_v9  ;;  %v459_v14 = vand.u32 2147483648, %v447_v9  ;;  %v457_v16 = vand.u32 2147483647, %v447_v9  ;;  %vm453_vm3 = vweird.f32 %v447_v9 }
 0x21b   :  { %776 = vrcp.f32 %v1023_v40 }
 0x21c   :  { %v460_v18 = vor.u32 1.1754944e-38, %v459_v14  ;;  %vm458_vm5 = vcmp.eq.f32.partialorder %v457_v16, 8.507059e+37 }
 0x220   :  { %v775_v10 = vpop.eup %774 }
 0x221   :  { %v449_v12 = vmul.f32 %v775_v10, %v447_v9  ;;  %vm454_vm15 = vweird.f32 %v775_v10  ;;  %v777_v41 = vpop.eup %776 }
 0x222   :  { %vm455_vm4 = vmor %vm453_vm3, %vm454_vm15  ;;  %v645_v42 = vmul.f32 32.0, %v777_v41 }
 0x223   :  { %v450_v13 = vsub.f32 1.0, %v449_v12 }
 0x224   :  { %v646_v43 = vsub.f32 1.0, %v645_v42 }
 0x225   :  { %v451_v15 = vmul.f32 %v775_v10, %v450_v13 }
 0x226   :  { %v647_v44 = vmul.f32 %v777_v41, %v646_v43 }
 0x227   :  { %v452_v17 = vadd.f32 %v775_v10, %v451_v15 }
 0x228   :  { %v648_v45 = vadd.f32 %v777_v41, %v647_v44 }
 0x229   :  { %v456_v19 = vsel %vm455_vm4, %v775_v10, %v452_v17 }
 0x22a   :  { %v461_v20 = vsel %vm458_vm5, %v460_v18, %v456_v19 }
 0x22b   :  { %v462_v21 = vmul.f32 %v773_v2, %v461_v20 }
 0x22d   :  { %464 = vst.msk [vmem:[#allocation15 + $0x10] sm:$0xff] %vm255_vm2, %v462_v21  ;;  %730 = vmatmul.msk.f32.vlgmr.msrb.gmra.mxu3 %vm255_vm2, %v462_v21  ;;  %vm594_vm2 = vcmask 392192  }
 0x22e   :  { %704 = dma.vmem_to_hbm [thread:$0]  %s697_s17, 512, %s699_s20, [#allocation16], %s1010_s27, %s1010_s27, %s1011_s28  }
 0x255   :  { %v399_v22 = vpop.f32.mrf.mxu1 }
 0x256   :  { %581 = vrot.lane.b32.xlu0 %v399_v22, %s1020_s13 }
 0x25d   :  { %v577_v23 = vpop.f32.mrf.mxu1 }
 0x25e   :  { %589 = vrot.lane.b32.xlu2 %v577_v23, %s1021_s3 }
 0x2b0   :  { %v488_v27 = vpop.f32.mrf.mxu3 }
 0x2b1   :  { %585 = vrot.lane.b32.xlu1 %v488_v27, %s1022_s14 }
 0x2b8   :  { %v590_v32 = vpop.permute.xlu2 %589 }
 0x2c8   :  { %v582_v29 = vpop.permute.xlu0 %581 }
 0x2c9   :  { %v592_v30 = vsel %vm227_vm1, %v309_v54, %v582_v29  ;;  %vm649_vm1 = vweird.f32 %v777_v41 }
 0x2ca   :  { %v650_v46 = vsel %vm649_vm1, %v777_v41, %v648_v45 }
 0x323   :  { %v586_v31 = vpop.permute.xlu1 %585 }
 0x324   :  { %v593_v33 = vsel %vm149_vm0, %v592_v30, %v586_v31 }
 0x325   :  { %v595_v34 = vsel %vm594_vm2, %v593_v33, %v590_v32 }
 0x326   :  { %738 = vmatmul.msk.f32.vlgmr.msrb.gmra.mxu2 %vm604_vm6, %v595_v34 }
 0x3a9   :  { %v637_v36 = vpop.f32.mrf.mxu2 }
 0x3aa   :  { %v638_v37 = vadd.f32 %v757_v35, %v637_v36 }
 0x3ac   :  { %v640_v38 = vadd.f32 %v638_v37, %v1119_v11 }
 0x3ae   :  { %v641_v39 = vsel %vm149_vm0, %v640_v38, 0.0 }
 0x3af   :  { %642 = vadd.xlane.f32.xlu0 %v641_v39 }
 0x422   :  { %v643_v47 = vpop.xlane.xlu0 %642 }
 0x423   :  { %v651_v48 = vmul.f32 %v650_v46, %v643_v47 }
 0x425   :  { %v652_v49 = vsub.f32 %v640_v38, %v651_v48 }
 0x427   :  { %v653_v50 = vmul.f32 %v652_v49, %v652_v49 }
 0x429   :  { %v654_v51 = vsel %vm149_vm0, %v653_v50, 0.0 }
 0x42a   :  { %655 = vadd.xlane.f32.xlu1 %v654_v51 }
 0x49d   :  { %v656_v11 = vpop.xlane.xlu1 %655 }
 0x49e   :  { %v657_v52 = vmul.f32 %v656_v11, %v650_v46 }
 0x4a0   :  { %v658_v53 = vadd.f32 1e-05, %v657_v52 }
 0x4a2   :  { %778 = vrsqrt.f32 %v658_v53  ;;  %vm665_vm8 = vweird.f32 %v658_v53 }
 0x4a8   :  { %v779_v54 = vpop.eup %778 }
 0x4a9   :  { %v660_v55 = vmul.f32 %v779_v54, %v658_v53  ;;  %vm666_vm7 = vweird.f32 %v779_v54 }
 0x4aa   :  { %vm667_vm9 = vmor %vm665_vm8, %vm666_vm7 }
 0x4ab   :  { %v661_v56 = vmul.f32 %v779_v54, %v660_v55 }
 0x4ad   :  { %v662_v57 = vmul.f32 0.5, %v661_v56 }
 0x4af   :  { %v663_v58 = vsub.f32 1.5, %v662_v57 }
 0x4b1   :  { %v664_v59 = vmul.f32 %v779_v54, %v663_v58 }
 0x4b3   :  { %v668_v61 = vsel %vm667_vm9, %v779_v54, %v664_v59 }
 0x4b4   :  { %v669_v62 = vmul.f32 %v668_v61, %v652_v49 }
 0x4b6   :  { %v674_v0 = vmul.f32 %v758_v60, %v669_v62 }
 0x4b8   :  { %v679_v1 = vadd.f32 %v759_v63, %v674_v0 }
 0x4ba   :  { %680 = vst.msk [vmem:[#allocation14] sm:$0xff] %vm149_vm0, %v679_v1 }
 0x4bb   :  { %691 = dma.vmem_to_hbm [thread:$0]  %s687_s22, 128, %s689_s24, [#allocation4]  }
 0x4bc   :  { %1004 = dma.done.wait [#allocation4], 128  }
 0x4bd   :  { %1005 = vsyncadd [#allocation4], 4294967168 }
 0x4be   :  { %1006 = dma.done.wait [#allocation16], 512  }
 0x4bf   :  { %1007 = vsyncadd [#allocation16], 4294966784 }
 0x4c0   :  { %713 = vsyncpa [#allocation3], 1 }
 0x4c1   :  { %714 = vsyncpa [#allocation6], 1 }
 0x4c2   :  { %715 = vsyncpa [#allocation9], 1 }
 0x4c3   :  { %716 = vsyncpa [#allocation12], 1 }
 0x4c4   :  { %717 = vsyncpa [#allocation4], 1 }
 0x4c5   :  { %718 = vsyncpa [#allocation16], 1 }

</bundles_post_ra>
